<compile_context>
chip_gen: v7x
topology: tpu7x:2x2x1
jax: 0.10.0
libtpu: 0.0.40
codegen_flags: <defaults>
</compile_context>

<pallas_src>
import numpy as np
import jax
import jax.numpy as jnp
from jax import lax
from jax.experimental import pallas as pl
from jax.experimental.pallas import tpu as pltpu

EPS = 1e-5


# ----------------------------------------------------------------------------
# Wrapper-side constant-matrix builders (run once, outside the kernel).
# ----------------------------------------------------------------------------
def _shift_mats(N, H):
    """(3, N*H, N*H) row-shift matrices S_ky:  (S_ky @ X)[n*H+h] = X[n*H+h+ky-1]
    if 0 <= h+ky-1 < H (same image), else 0 (the conv's H zero-padding)."""
    NH = N * H
    mats = np.zeros((3, NH, NH), np.float32)
    r = np.arange(NH)
    h = r % H
    for ky in range(3):
        dy = ky - 1
        valid = (h + dy >= 0) & (h + dy < H)
        rows = r[valid]
        mats[ky, rows, rows + dy] = 1.0
    return mats


def _mix_mats(w_oihw, W):
    """(3, W*Cin, W*Cout) block-banded mixing matrices M_ky folding the kx taps
    and channel mixing:  M_ky[wi*Cin+ci, wo*Cout+co] = w[co, ci, ky, wi-wo+1]."""
    w = np.asarray(w_oihw, np.float32)            # (Cout, Cin, 3, 3)
    Cout, Cin = w.shape[0], w.shape[1]
    mats = np.zeros((3, W * Cin, W * Cout), np.float32)
    for ky in range(3):
        for kx in range(3):
            dx = kx - 1
            blk = w[:, :, ky, kx].T               # (Cin, Cout)
            for wo in range(W):
                wi = wo + dx
                if 0 <= wi < W:
                    mats[ky,
                         wi * Cin:(wi + 1) * Cin,
                         wo * Cout:(wo + 1) * Cout] = blk
    return mats


# ----------------------------------------------------------------------------
# Kernel
# ----------------------------------------------------------------------------
def _bn_relu_folded(x, gamma, beta, sel, selT, inv_total):
    """Training-mode BN (biased stats) folded into one FMA, + ReLU.
    x: (NH, W*C) lane-dense slab; gamma/beta: (1, C); sel: (W*C, C)."""
    s1 = jnp.sum(x, axis=0, keepdims=True)                       # (1, W*C)
    s2 = jnp.sum(x * x, axis=0, keepdims=True)                   # (1, W*C)
    cs1 = jnp.dot(s1, sel, preferred_element_type=jnp.float32)   # (1, C)
    cs2 = jnp.dot(s2, sel, preferred_element_type=jnp.float32)   # (1, C)
    mean = cs1 * inv_total
    var = cs2 * inv_total - mean * mean
    a = gamma * lax.rsqrt(var + EPS)                             # (1, C)
    b = beta - mean * a
    a_w = jnp.dot(a, selT, preferred_element_type=jnp.float32)   # (1, W*C)
    b_w = jnp.dot(b, selT, preferred_element_type=jnp.float32)
    return jnp.maximum(x * a_w + b_w, 0.0)


def _conv3x3_packed(x, s_ref, m_ref):
    """3x3 conv, stride 1, pad 1, as three MXU matmuls on the packed slab."""
    acc = jnp.dot(x, m_ref[1], preferred_element_type=jnp.float32)       # ky=1 (no shift)
    for ky in (0, 2):
        xs = jnp.dot(s_ref[ky], x, preferred_element_type=jnp.float32)   # H shift
        acc = acc + jnp.dot(xs, m_ref[ky], preferred_element_type=jnp.float32)
    return acc


def prebasic_kernel(x_ref, s_ref, m1_ref, m2_ref, sel_ref, selT_ref,
                    g1_ref, b1_ref, g2_ref, b2_ref, o_ref):
    NH, WC = x_ref.shape
    C = g1_ref.shape[-1]
    inv_total = 1.0 / float(NH * (WC // C))      # 1 / (N*H*W)

    x = x_ref[...].astype(jnp.float32)
    sel = sel_ref[...]
    selT = selT_ref[...]

    out = _bn_relu_folded(x, g1_ref[...], b1_ref[...], sel, selT, inv_total)
    out = _conv3x3_packed(out, s_ref, m1_ref)
    out = _bn_relu_folded(out, g2_ref[...], b2_ref[...], sel, selT, inv_total)
    out = _conv3x3_packed(out, s_ref, m2_ref)

    # downsample is None and stride == 1 -> residual is the raw input
    o_ref[...] = (out + x).astype(o_ref.dtype)


# ----------------------------------------------------------------------------
# Wrapper
# ----------------------------------------------------------------------------
def prebasic_block(x_nchw, w1_oihw, w2_oihw, g1, b1, g2, b2):
    N, C, H, W = x_nchw.shape
    Cout = w1_oihw.shape[0]
    assert Cout == C and w2_oihw.shape[0] == C, "block assumes inplanes == planes"
    NH, WC = N * H, W * C

    # NCHW -> lane-dense (N*H, W*C) slab.
    x = jnp.transpose(x_nchw, (0, 2, 3, 1)).reshape(NH, WC)

    s_mats = jnp.asarray(_shift_mats(N, H))                    # (3, NH, NH)
    m1 = jnp.asarray(_mix_mats(w1_oihw, W))                    # (3, WC, WC)
    m2 = jnp.asarray(_mix_mats(w2_oihw, W))
    sel_np = np.tile(np.eye(C, dtype=np.float32), (W, 1))      # (WC, C)
    sel = jnp.asarray(sel_np)
    selT = jnp.asarray(np.ascontiguousarray(sel_np.T))         # (C, WC)

    vmem = pl.BlockSpec(memory_space=pltpu.MemorySpace.VMEM)
    out_packed = pl.pallas_call(
        prebasic_kernel,
        out_shape=jax.ShapeDtypeStruct((NH, WC), x_nchw.dtype),
        in_specs=[vmem] * 10,
        out_specs=vmem,
    )(x, s_mats, m1, m2, sel, selT,
      g1.reshape(1, -1).astype(jnp.float32), b1.reshape(1, -1).astype(jnp.float32),
      g2.reshape(1, -1).astype(jnp.float32), b2.reshape(1, -1).astype(jnp.float32))

    return jnp.transpose(out_packed.reshape(N, H, W, C), (0, 3, 1, 2))


# ----------------------------------------------------------------------------
# Pure-JAX reference of the PyTorch forward (NCHW) for self-validation.
# ----------------------------------------------------------------------------
def reference(x, w1, w2, g1, b1, g2, b2):
    def bn_relu(t, g, b):
        m = t.mean(axis=(0, 2, 3), keepdims=True)
        v = ((t - m) ** 2).mean(axis=(0, 2, 3), keepdims=True)
        y = (t - m) / jnp.sqrt(v + EPS) * g.reshape(1, -1, 1, 1) + b.reshape(1, -1, 1, 1)
        return jnp.maximum(y, 0.0)

    def conv(t, w):
        return lax.conv_general_dilated(
            t, w, (1, 1), ((1, 1), (1, 1)),
            dimension_numbers=("NCHW", "OIHW", "NCHW"))

    out = conv(bn_relu(x, g1, b1), w1)
    out = conv(bn_relu(out, g2, b2), w2)
    return out + x


if __name__ == "__main__":
    key = jax.random.PRNGKey(0)
    kx, kw1, kw2, kg1, kb1, kg2, kb2 = jax.random.split(key, 7)
    N, C, H, W = 2, 8, 16, 16          # inplanes == planes == 8, stride = 1 (W*C = 128)
    x = jax.random.normal(kx, (N, C, H, W), jnp.float32)
    w1 = jax.random.normal(kw1, (C, C, 3, 3), jnp.float32) * 0.1
    w2 = jax.random.normal(kw2, (C, C, 3, 3), jnp.float32) * 0.1
    g1 = 1.0 + 0.1 * jax.random.normal(kg1, (C,), jnp.float32)
    b1 = 0.1 * jax.random.normal(kb1, (C,), jnp.float32)
    g2 = 1.0 + 0.1 * jax.random.normal(kg2, (C,), jnp.float32)
    b2 = 0.1 * jax.random.normal(kb2, (C,), jnp.float32)

    out = prebasic_block(x, w1, w2, g1, b1, g2, b2)
    out = jax.block_until_ready(out)

    ref = reference(x, w1, w2, g1, b1, g2, b2)
    assert jnp.allclose(out, ref, atol=1e-3, rtol=1e-3), \
        float(jnp.max(jnp.abs(out - ref)))
    print("KERNEL_OK")
</pallas_src>

<mosaic_0001>
module attributes {stable_mosaic.version = 11 : i64} {
  func.func @prebasic_kernel(%arg0: memref<32x128xf32, #tpu.memory_space<vmem>>, %arg1: memref<3x32x32xf32, #tpu.memory_space<vmem>>, %arg2: memref<3x128x128xf32, #tpu.memory_space<vmem>>, %arg3: memref<3x128x128xf32, #tpu.memory_space<vmem>>, %arg4: memref<128x8xf32, #tpu.memory_space<vmem>>, %arg5: memref<8x128xf32, #tpu.memory_space<vmem>>, %arg6: memref<1x8xf32, #tpu.memory_space<vmem>>, %arg7: memref<1x8xf32, #tpu.memory_space<vmem>>, %arg8: memref<1x8xf32, #tpu.memory_space<vmem>>, %arg9: memref<1x8xf32, #tpu.memory_space<vmem>>, %arg10: memref<32x128xf32, #tpu.memory_space<vmem>>) attributes {dimension_semantics = [], scalar_prefetch = 0 : i64, scratch_operands = 0 : i64, tpu.core_type = #tpu.core_type<tc>} {
    %c0 = arith.constant 0 : index
    %c0_0 = arith.constant 0 : index
    %0 = vector.load %arg0[%c0, %c0_0] : memref<32x128xf32, #tpu.memory_space<vmem>>, vector<32x128xf32>
    %c0_1 = arith.constant 0 : index
    %c0_2 = arith.constant 0 : index
    %1 = vector.load %arg4[%c0_1, %c0_2] : memref<128x8xf32, #tpu.memory_space<vmem>>, vector<128x8xf32>
    %c0_3 = arith.constant 0 : index
    %c0_4 = arith.constant 0 : index
    %2 = vector.load %arg5[%c0_3, %c0_4] : memref<8x128xf32, #tpu.memory_space<vmem>>, vector<8x128xf32>
    %c0_5 = arith.constant 0 : index
    %c0_6 = arith.constant 0 : index
    %3 = vector.load %arg6[%c0_5, %c0_6] : memref<1x8xf32, #tpu.memory_space<vmem>>, vector<1x8xf32>
    %c0_7 = arith.constant 0 : index
    %c0_8 = arith.constant 0 : index
    %4 = vector.load %arg7[%c0_7, %c0_8] : memref<1x8xf32, #tpu.memory_space<vmem>>, vector<1x8xf32>
    %cst = arith.constant dense<0.000000e+00> : vector<128xf32>
    %5 = vector.multi_reduction <add>, %0, %cst [0] : vector<32x128xf32> to vector<128xf32>
    %6 = vector.shape_cast %5 : vector<128xf32> to vector<1x128xf32>
    %7 = arith.mulf %0, %0 : vector<32x128xf32>
    %cst_9 = arith.constant dense<0.000000e+00> : vector<128xf32>
    %8 = vector.multi_reduction <add>, %7, %cst_9 [0] : vector<32x128xf32> to vector<128xf32>
    %9 = vector.shape_cast %8 : vector<128xf32> to vector<1x128xf32>
    %cst_10 = arith.constant dense<0.000000e+00> : vector<1x8xf32>
    %10 = tpu.matmul %6, %1, %cst_10 {dimension_numbers = #tpu.dot_dimension_numbers<[1], [0], [0], [1], [0, 0, 1, 1], [], []>} : vector<1x128xf32>, vector<128x8xf32>, vector<1x8xf32> -> vector<1x8xf32>
    %cst_11 = arith.constant dense<0.000000e+00> : vector<1x8xf32>
    %11 = tpu.matmul %9, %1, %cst_11 {dimension_numbers = #tpu.dot_dimension_numbers<[1], [0], [0], [1], [0, 0, 1, 1], [], []>} : vector<1x128xf32>, vector<128x8xf32>, vector<1x8xf32> -> vector<1x8xf32>
    %cst_12 = arith.constant 0.001953125 : f32
    %12 = vector.broadcast %cst_12 : f32 to vector<1x8xf32>
    %13 = arith.mulf %10, %12 : vector<1x8xf32>
    %cst_13 = arith.constant 0.001953125 : f32
    %14 = vector.broadcast %cst_13 : f32 to vector<1x8xf32>
    %15 = arith.mulf %11, %14 : vector<1x8xf32>
    %16 = arith.mulf %13, %13 : vector<1x8xf32>
    %17 = arith.subf %15, %16 : vector<1x8xf32>
    %cst_14 = arith.constant 9.99999974E-6 : f32
    %18 = vector.broadcast %cst_14 : f32 to vector<1x8xf32>
    %19 = arith.addf %17, %18 : vector<1x8xf32>
    %20 = math.rsqrt %19 : vector<1x8xf32>
    %21 = arith.mulf %3, %20 : vector<1x8xf32>
    %22 = arith.mulf %13, %21 : vector<1x8xf32>
    %23 = arith.subf %4, %22 : vector<1x8xf32>
    %cst_15 = arith.constant dense<0.000000e+00> : vector<1x128xf32>
    %24 = tpu.matmul %21, %2, %cst_15 {dimension_numbers = #tpu.dot_dimension_numbers<[1], [0], [0], [1], [0, 0, 1, 1], [], []>} : vector<1x8xf32>, vector<8x128xf32>, vector<1x128xf32> -> vector<1x128xf32>
    %cst_16 = arith.constant dense<0.000000e+00> : vector<1x128xf32>
    %25 = tpu.matmul %23, %2, %cst_16 {dimension_numbers = #tpu.dot_dimension_numbers<[1], [0], [0], [1], [0, 0, 1, 1], [], []>} : vector<1x8xf32>, vector<8x128xf32>, vector<1x128xf32> -> vector<1x128xf32>
    %26 = vector.broadcast %24 : vector<1x128xf32> to vector<32x128xf32>
    %27 = arith.mulf %0, %26 : vector<32x128xf32>
    %28 = vector.broadcast %25 : vector<1x128xf32> to vector<32x128xf32>
    %29 = arith.addf %27, %28 : vector<32x128xf32>
    %cst_17 = arith.constant 0.000000e+00 : f32
    %30 = vector.broadcast %cst_17 : f32 to vector<32x128xf32>
    %31 = arith.maximumf %29, %30 : vector<32x128xf32>
    %c1 = arith.constant 1 : index
    %c0_18 = arith.constant 0 : index
    %c0_19 = arith.constant 0 : index
    %32 = vector.load %arg2[%c1, %c0_18, %c0_19] : memref<3x128x128xf32, #tpu.memory_space<vmem>>, vector<1x128x128xf32>
    %33 = vector.shape_cast %32 : vector<1x128x128xf32> to vector<128x128xf32>
    %cst_20 = arith.constant dense<0.000000e+00> : vector<32x128xf32>
    %34 = tpu.matmul %31, %33, %cst_20 {dimension_numbers = #tpu.dot_dimension_numbers<[1], [0], [0], [1], [0, 0, 1, 1], [], []>} : vector<32x128xf32>, vector<128x128xf32>, vector<32x128xf32> -> vector<32x128xf32>
    %c0_21 = arith.constant 0 : index
    %c0_22 = arith.constant 0 : index
    %c0_23 = arith.constant 0 : index
    %35 = vector.load %arg1[%c0_21, %c0_22, %c0_23] : memref<3x32x32xf32, #tpu.memory_space<vmem>>, vector<1x32x32xf32>
    %36 = vector.shape_cast %35 : vector<1x32x32xf32> to vector<32x32xf32>
    %cst_24 = arith.constant dense<0.000000e+00> : vector<32x128xf32>
    %37 = tpu.matmul %36, %31, %cst_24 {dimension_numbers = #tpu.dot_dimension_numbers<[1], [0], [0], [1], [0, 0, 1, 1], [], []>} : vector<32x32xf32>, vector<32x128xf32>, vector<32x128xf32> -> vector<32x128xf32>
    %c0_25 = arith.constant 0 : index
    %c0_26 = arith.constant 0 : index
    %c0_27 = arith.constant 0 : index
    %38 = vector.load %arg2[%c0_25, %c0_26, %c0_27] : memref<3x128x128xf32, #tpu.memory_space<vmem>>, vector<1x128x128xf32>
    %39 = vector.shape_cast %38 : vector<1x128x128xf32> to vector<128x128xf32>
    %cst_28 = arith.constant dense<0.000000e+00> : vector<32x128xf32>
    %40 = tpu.matmul %37, %39, %cst_28 {dimension_numbers = #tpu.dot_dimension_numbers<[1], [0], [0], [1], [0, 0, 1, 1], [], []>} : vector<32x128xf32>, vector<128x128xf32>, vector<32x128xf32> -> vector<32x128xf32>
    %41 = arith.addf %34, %40 : vector<32x128xf32>
    %c2 = arith.constant 2 : index
    %c0_29 = arith.constant 0 : index
    %c0_30 = arith.constant 0 : index
    %42 = vector.load %arg1[%c2, %c0_29, %c0_30] : memref<3x32x32xf32, #tpu.memory_space<vmem>>, vector<1x32x32xf32>
    %43 = vector.shape_cast %42 : vector<1x32x32xf32> to vector<32x32xf32>
    %cst_31 = arith.constant dense<0.000000e+00> : vector<32x128xf32>
    %44 = tpu.matmul %43, %31, %cst_31 {dimension_numbers = #tpu.dot_dimension_numbers<[1], [0], [0], [1], [0, 0, 1, 1], [], []>} : vector<32x32xf32>, vector<32x128xf32>, vector<32x128xf32> -> vector<32x128xf32>
    %c2_32 = arith.constant 2 : index
    %c0_33 = arith.constant 0 : index
    %c0_34 = arith.constant 0 : index
    %45 = vector.load %arg2[%c2_32, %c0_33, %c0_34] : memref<3x128x128xf32, #tpu.memory_space<vmem>>, vector<1x128x128xf32>
    %46 = vector.shape_cast %45 : vector<1x128x128xf32> to vector<128x128xf32>
    %cst_35 = arith.constant dense<0.000000e+00> : vector<32x128xf32>
    %47 = tpu.matmul %44, %46, %cst_35 {dimension_numbers = #tpu.dot_dimension_numbers<[1], [0], [0], [1], [0, 0, 1, 1], [], []>} : vector<32x128xf32>, vector<128x128xf32>, vector<32x128xf32> -> vector<32x128xf32>
    %48 = arith.addf %41, %47 : vector<32x128xf32>
    %c0_36 = arith.constant 0 : index
    %c0_37 = arith.constant 0 : index
    %49 = vector.load %arg8[%c0_36, %c0_37] : memref<1x8xf32, #tpu.memory_space<vmem>>, vector<1x8xf32>
    %c0_38 = arith.constant 0 : index
    %c0_39 = arith.constant 0 : index
    %50 = vector.load %arg9[%c0_38, %c0_39] : memref<1x8xf32, #tpu.memory_space<vmem>>, vector<1x8xf32>
    %cst_40 = arith.constant dense<0.000000e+00> : vector<128xf32>
    %51 = vector.multi_reduction <add>, %48, %cst_40 [0] : vector<32x128xf32> to vector<128xf32>
    %52 = vector.shape_cast %51 : vector<128xf32> to vector<1x128xf32>
    %53 = arith.mulf %48, %48 : vector<32x128xf32>
    %cst_41 = arith.constant dense<0.000000e+00> : vector<128xf32>
    %54 = vector.multi_reduction <add>, %53, %cst_41 [0] : vector<32x128xf32> to vector<128xf32>
    %55 = vector.shape_cast %54 : vector<128xf32> to vector<1x128xf32>
    %cst_42 = arith.constant dense<0.000000e+00> : vector<1x8xf32>
    %56 = tpu.matmul %52, %1, %cst_42 {dimension_numbers = #tpu.dot_dimension_numbers<[1], [0], [0], [1], [0, 0, 1, 1], [], []>} : vector<1x128xf32>, vector<128x8xf32>, vector<1x8xf32> -> vector<1x8xf32>
    %cst_43 = arith.constant dense<0.000000e+00> : vector<1x8xf32>
    %57 = tpu.matmul %55, %1, %cst_43 {dimension_numbers = #tpu.dot_dimension_numbers<[1], [0], [0], [1], [0, 0, 1, 1], [], []>} : vector<1x128xf32>, vector<128x8xf32>, vector<1x8xf32> -> vector<1x8xf32>
    %cst_44 = arith.constant 0.001953125 : f32
    %58 = vector.broadcast %cst_44 : f32 to vector<1x8xf32>
    %59 = arith.mulf %56, %58 : vector<1x8xf32>
    %cst_45 = arith.constant 0.001953125 : f32
    %60 = vector.broadcast %cst_45 : f32 to vector<1x8xf32>
    %61 = arith.mulf %57, %60 : vector<1x8xf32>
    %62 = arith.mulf %59, %59 : vector<1x8xf32>
    %63 = arith.subf %61, %62 : vector<1x8xf32>
    %cst_46 = arith.constant 9.99999974E-6 : f32
    %64 = vector.broadcast %cst_46 : f32 to vector<1x8xf32>
    %65 = arith.addf %63, %64 : vector<1x8xf32>
    %66 = math.rsqrt %65 : vector<1x8xf32>
    %67 = arith.mulf %49, %66 : vector<1x8xf32>
    %68 = arith.mulf %59, %67 : vector<1x8xf32>
    %69 = arith.subf %50, %68 : vector<1x8xf32>
    %cst_47 = arith.constant dense<0.000000e+00> : vector<1x128xf32>
    %70 = tpu.matmul %67, %2, %cst_47 {dimension_numbers = #tpu.dot_dimension_numbers<[1], [0], [0], [1], [0, 0, 1, 1], [], []>} : vector<1x8xf32>, vector<8x128xf32>, vector<1x128xf32> -> vector<1x128xf32>
    %cst_48 = arith.constant dense<0.000000e+00> : vector<1x128xf32>
    %71 = tpu.matmul %69, %2, %cst_48 {dimension_numbers = #tpu.dot_dimension_numbers<[1], [0], [0], [1], [0, 0, 1, 1], [], []>} : vector<1x8xf32>, vector<8x128xf32>, vector<1x128xf32> -> vector<1x128xf32>
    %72 = vector.broadcast %70 : vector<1x128xf32> to vector<32x128xf32>
    %73 = arith.mulf %48, %72 : vector<32x128xf32>
    %74 = vector.broadcast %71 : vector<1x128xf32> to vector<32x128xf32>
    %75 = arith.addf %73, %74 : vector<32x128xf32>
    %cst_49 = arith.constant 0.000000e+00 : f32
    %76 = vector.broadcast %cst_49 : f32 to vector<32x128xf32>
    %77 = arith.maximumf %75, %76 : vector<32x128xf32>
    %c1_50 = arith.constant 1 : index
    %c0_51 = arith.constant 0 : index
    %c0_52 = arith.constant 0 : index
    %78 = vector.load %arg3[%c1_50, %c0_51, %c0_52] : memref<3x128x128xf32, #tpu.memory_space<vmem>>, vector<1x128x128xf32>
    %79 = vector.shape_cast %78 : vector<1x128x128xf32> to vector<128x128xf32>
    %cst_53 = arith.constant dense<0.000000e+00> : vector<32x128xf32>
    %80 = tpu.matmul %77, %79, %cst_53 {dimension_numbers = #tpu.dot_dimension_numbers<[1], [0], [0], [1], [0, 0, 1, 1], [], []>} : vector<32x128xf32>, vector<128x128xf32>, vector<32x128xf32> -> vector<32x128xf32>
    %c0_54 = arith.constant 0 : index
    %c0_55 = arith.constant 0 : index
    %c0_56 = arith.constant 0 : index
    %81 = vector.load %arg1[%c0_54, %c0_55, %c0_56] : memref<3x32x32xf32, #tpu.memory_space<vmem>>, vector<1x32x32xf32>
    %82 = vector.shape_cast %81 : vector<1x32x32xf32> to vector<32x32xf32>
    %cst_57 = arith.constant dense<0.000000e+00> : vector<32x128xf32>
    %83 = tpu.matmul %82, %77, %cst_57 {dimension_numbers = #tpu.dot_dimension_numbers<[1], [0], [0], [1], [0, 0, 1, 1], [], []>} : vector<32x32xf32>, vector<32x128xf32>, vector<32x128xf32> -> vector<32x128xf32>
    %c0_58 = arith.constant 0 : index
    %c0_59 = arith.constant 0 : index
    %c0_60 = arith.constant 0 : index
    %84 = vector.load %arg3[%c0_58, %c0_59, %c0_60] : memref<3x128x128xf32, #tpu.memory_space<vmem>>, vector<1x128x128xf32>
    %85 = vector.shape_cast %84 : vector<1x128x128xf32> to vector<128x128xf32>
    %cst_61 = arith.constant dense<0.000000e+00> : vector<32x128xf32>
    %86 = tpu.matmul %83, %85, %cst_61 {dimension_numbers = #tpu.dot_dimension_numbers<[1], [0], [0], [1], [0, 0, 1, 1], [], []>} : vector<32x128xf32>, vector<128x128xf32>, vector<32x128xf32> -> vector<32x128xf32>
    %87 = arith.addf %80, %86 : vector<32x128xf32>
    %c2_62 = arith.constant 2 : index
    %c0_63 = arith.constant 0 : index
    %c0_64 = arith.constant 0 : index
    %88 = vector.load %arg1[%c2_62, %c0_63, %c0_64] : memref<3x32x32xf32, #tpu.memory_space<vmem>>, vector<1x32x32xf32>
    %89 = vector.shape_cast %88 : vector<1x32x32xf32> to vector<32x32xf32>
    %cst_65 = arith.constant dense<0.000000e+00> : vector<32x128xf32>
    %90 = tpu.matmul %89, %77, %cst_65 {dimension_numbers = #tpu.dot_dimension_numbers<[1], [0], [0], [1], [0, 0, 1, 1], [], []>} : vector<32x32xf32>, vector<32x128xf32>, vector<32x128xf32> -> vector<32x128xf32>
    %c2_66 = arith.constant 2 : index
    %c0_67 = arith.constant 0 : index
    %c0_68 = arith.constant 0 : index
    %91 = vector.load %arg3[%c2_66, %c0_67, %c0_68] : memref<3x128x128xf32, #tpu.memory_space<vmem>>, vector<1x128x128xf32>
    %92 = vector.shape_cast %91 : vector<1x128x128xf32> to vector<128x128xf32>
    %cst_69 = arith.constant dense<0.000000e+00> : vector<32x128xf32>
    %93 = tpu.matmul %90, %92, %cst_69 {dimension_numbers = #tpu.dot_dimension_numbers<[1], [0], [0], [1], [0, 0, 1, 1], [], []>} : vector<32x128xf32>, vector<128x128xf32>, vector<32x128xf32> -> vector<32x128xf32>
    %94 = arith.addf %87, %93 : vector<32x128xf32>
    %95 = arith.addf %94, %0 : vector<32x128xf32>
    %c0_70 = arith.constant 0 : index
    %c0_71 = arith.constant 0 : index
    %96 = vector.load %arg10[%c0_70, %c0_71] : memref<32x128xf32, #tpu.memory_space<vmem>>, vector<32x128xf32>
    tpu.vector_store %arg10[%c0_70, %c0_71], %95 {strides = array<i32>} : memref<32x128xf32, #tpu.memory_space<vmem>>, vector<32x128xf32>,
    return
  }
}

</mosaic_0001>

<bundles_post_ra>
// kernel: tpu_custom_call.1
= control target key start
LH: loop header
LB: loop body
LE: loop exit
PB: predicated region body
PF: predicated region fallthrough
CT: control target
= control target key end

     0   :  { %15 = vsyncpa [#allocation3], 0  ;;  %s3407_s0 = inlined_call_operand.vmem [shape: f32[32,128], index: 0, kind: input, shape index: {}]   ;;  %s3408_s1 = inlined_call_operand.vmem [shape: f32[3,32,32], index: 1, kind: input, shape index: {}]   ;;  %s3409_s2 = inlined_call_operand.hbm [shape: f32[3,128,128], index: 2, kind: input, shape index: {}]   ;;  %s3410_s3 = inlined_call_operand.hbm [shape: f32[3,128,128], index: 3, kind: input, shape index: {}]   ;;  %s3411_s4 = inlined_call_operand.vmem [shape: f32[128,8], index: 4, kind: input, shape index: {}]   ;;  %s3412_s5 = inlined_call_operand.vmem [shape: f32[8,128], index: 5, kind: input, shape index: {}]   ;;  %s3413_s6 = inlined_call_operand.vmem [shape: f32[1,8], index: 6, kind: input, shape index: {}]   ;;  %s3414_s7 = inlined_call_operand.vmem [shape: f32[1,8], index: 7, kind: input, shape index: {}]   ;;  %s3415_s8 = inlined_call_operand.vmem [shape: f32[1,8], index: 8, kind: input, shape index: {}]   ;;  %s3416_s9 = inlined_call_operand.vmem [shape: f32[1,8], index: 9, kind: input, shape index: {}]   ;;  %s3417_s10 = inlined_call_operand.hbm [shape: f32[32,128], index: 10, kind: output, shape index: {}]  }
   0x1   :  { %16 = vsyncpa [#allocation6], 0 }
   0x2   :  { %17 = vsyncpa [#allocation4], 0  ;;  %s2902_s13 = smov [#allocation2]   ;;  %s2830_s17 = scalar_lea.hbm %s3409_s2, 6144 }
   0x3   :  { %s27_s14 = sshll.u32 %s2902_s13, 4  ;;  %p2831_p0 = scmp.ne.s32.totalorder %s3409_s2, %s2830_s17  ;;  %s28_s14 = int_to_ptr.vmem [resolvable:$true] %s27_s14 }
   0x4   :  { %p2834_p1 = scmp.lt.u32.totalorder %s2830_s17, %s3409_s2 }
   0x6   :  { %p2836_p2 = pnand %p2834_p1, %p2831_p0 }
   0x8   :  { %2839 = shalt.err (!%p2836_p2)
}
   0x9   :  { %s2840_s22 = scalar_lea.vmem %s28_s14, 6144  ;;  %p2845_p4 = scmp.lt.s32.totalorder %s28_s14, %s28_s14 }
   0xa   :  { %p2841_p3 = scmp.ne.s32.totalorder %s28_s14, %s2840_s22  ;;  %p2846_p5 = scmp.lt.s32.totalorder %s2840_s22, %s2840_s22 }
   0xc   :  { %p2847_p6 = por %p2846_p5, %p2845_p4 }
   0xe   :  { %p2848_p7 = pnand %p2847_p6, %p2841_p3 }
  0x10   :  { %2851 = shalt.err (!%p2848_p7)
}
  0x11   :  { %s2903_s23 = smov 128   ;;  %s2904_s24 = smov 8  }
  0x12   :  { %33 = dma.hbm_to_vmem [thread:$0]  %s3409_s2, 6144, %s28_s14, [#allocation3], %s2903_s23, %s2903_s23, %s2904_s24  }
  0x13   :  { %s2905_s27 = smov [#allocation5]   ;;  %s2852_s11 = scalar_lea.hbm %s3410_s3, 6144 }
  0x14   :  { %s39_s28 = sshll.u32 %s2905_s27, 4  ;;  %p2853_p8 = scmp.ne.s32.totalorder %s3410_s3, %s2852_s11  ;;  %s40_s28 = int_to_ptr.vmem [resolvable:$true] %s39_s28 }
  0x15   :  { %p2856_p9 = scmp.lt.u32.totalorder %s2852_s11, %s3410_s3 }
  0x17   :  { %p2858_p10 = pnand %p2856_p9, %p2853_p8 }
  0x19   :  { %2861 = shalt.err (!%p2858_p10)
}
  0x1a   :  { %s2862_s17 = scalar_lea.vmem %s40_s28, 6144  ;;  %p2867_p12 = scmp.lt.s32.totalorder %s40_s28, %s40_s28 }
  0x1b   :  { %p2863_p11 = scmp.ne.s32.totalorder %s40_s28, %s2862_s17  ;;  %p2868_p13 = scmp.lt.s32.totalorder %s2862_s17, %s2862_s17 }
  0x1d   :  { %p2869_p0 = por %p2868_p13, %p2867_p12 }
  0x1f   :  { %p2870_p1 = pnand %p2869_p0, %p2863_p11 }
  0x21   :  { %2873 = shalt.err (!%p2870_p1)
}
  0x22   :  { %45 = dma.hbm_to_vmem [thread:$0]  %s3410_s3, 6144, %s40_s28, [#allocation6], %s2903_s23, %s2903_s23, %s2904_s24  }
  0x23   :  { %2896 = dma.done.wait [#allocation3], 6144  }
  0x24   :  { %2897 = vsyncadd [#allocation3], 4294961152 }
  0x25   :  { %2898 = dma.done.wait [#allocation6], 6144  }
  0x26   :  { %2899 = vsyncadd [#allocation6], 4294961152  ;;  %v2906_v0 = vmov 0.0|0.0   ;;  %vm2907_vm0 = vmmov 0   ;;  %v2908_v1 = vmov 0.0   ;;  %v68_v2 = vld [vmem:[%s3411_s4] sm:$0xff] }
  0x27   :  { %2478 = vmatprep.subr.bf16.mxu1 %v2906_v0  ;;  %2066 = vmatprep.mubr.msk.f32.mxu1 %vm2907_vm0, %v2908_v1  ;;  %v69_v3 = vld [vmem:[%s3411_s4 + $0x8] sm:$0xff]  ;;  %v70_v4 = vld [vmem:[%s3411_s4 + $0x10] sm:$0xff]  ;;  %v71_v6 = vld [vmem:[%s3411_s4 + $0x18] sm:$0xff]  ;;  %vm258_vm1 = vcmask 64512   ;;  %vm446_vm2 = vcmask 261120   ;;  %s2909_s20 = smov [#allocation7]  }
  0x28   :  { %v3007_v5 = vpack.c.bf16 %v69_v3, %v68_v2  ;;  %v3013_v7 = vpack.c.bf16 %v71_v6, %v70_v4  ;;  %v72_v8 = vld [vmem:[%s3411_s4 + $0x20] sm:$0xff]  ;;  %v73_v9 = vld [vmem:[%s3411_s4 + $0x28] sm:$0xff]  ;;  %v3035_v12 = vld [vmem:[%s3407_s0 + $0x10] sm:$0xff] }
  0x29   :  { %v3025_v10 = vld [vmem:[%s3407_s0] sm:$0xff]  ;;  %v3030_v11 = vld [vmem:[%s3407_s0 + $0x8] sm:$0xff]  ;;  %v3040_v14 = vpack.c.bf16 %v73_v9, %v72_v8  ;;  %v3045_v15 = vld [vmem:[%s3407_s0 + $0x18] sm:$0xff]  ;;  %v98_v41 = vmul.f32 %v3035_v12, %v3035_v12 }
  0x2a   :  { %2480 = vmatpush3.bf16.msra.mxu1 %v3007_v5  ;;  %v87_v13 = vadd.f32 %v3030_v11, %v3025_v10  ;;  %v74_v16 = vld [vmem:[%s3411_s4 + $0x30] sm:$0xff]  ;;  %v75_v17 = vld [vmem:[%s3411_s4 + $0x38] sm:$0xff]  ;;  %v76_v21 = vld [vmem:[%s3411_s4 + $0x40] sm:$0xff]  ;;  %v96_v37 = vmul.f32 %v3025_v10, %v3025_v10  ;;  %v97_v38 = vmul.f32 %v3030_v11, %v3030_v11  ;;  %v99_v43 = vmul.f32 %v3045_v15, %v3045_v15 }
  0x2b   :  { %2481 = vmatprep.subr.bf16.mxu1 %v2906_v0  ;;  %v3057_v20 = vpack.c.bf16 %v75_v17, %v74_v16  ;;  %v77_v22 = vld [vmem:[%s3411_s4 + $0x48] sm:$0xff]  ;;  %v78_v26 = vld [vmem:[%s3411_s4 + $0x50] sm:$0xff]  ;;  %v79_v27 = vld [vmem:[%s3411_s4 + $0x58] sm:$0xff] }
  0x2c   :  { %v88_v18 = vadd.f32 %v87_v13, %v3035_v12  ;;  %v3067_v25 = vpack.c.bf16 %v77_v22, %v76_v21  ;;  %v3077_v29 = vpack.c.bf16 %v79_v27, %v78_v26  ;;  %v80_v30 = vld [vmem:[%s3411_s4 + $0x60] sm:$0xff]  ;;  %v81_v31 = vld [vmem:[%s3411_s4 + $0x68] sm:$0xff]  ;;  %v82_v34 = vld [vmem:[%s3411_s4 + $0x70] sm:$0xff]  ;;  %v100_v42 = vadd.f32 %v97_v38, %v96_v37 }
  0x2d   :  { %v3087_v33 = vpack.c.bf16 %v81_v31, %v80_v30  ;;  %v83_v35 = vld [vmem:[%s3411_s4 + $0x78] sm:$0xff]  ;;  %v3133_v52 = vld [vmem:[%s3412_s5] sm:$0xff]  ;;  %v405_v13 = vlaneseq  ;;  %v545_v38 = vld [vmem:[#allocation2 + $0x8] sm:$0xff]  ;;  %s1769_s5 = sshll.u32 %s2909_s20, 4  ;;  %s1770_s5 = int_to_ptr.vmem [resolvable:$true] %s1769_s5 }
  0x2e   :  { %2483 = vmatpush3.bf16.msra.mxu1 %v3013_v7  ;;  %v89_v19 = vadd.f32 %v88_v18, %v3045_v15  ;;  %v3101_v39 = vpack.c.bf16 %v83_v35, %v82_v34  ;;  %v101_v44 = vadd.f32 %v100_v42, %v98_v41  ;;  %v85_v62 = vld [vmem:[%s3413_s6] sm:$0x1]  ;;  %v546_v42 = vld [vmem:[#allocation2 + $0x10] sm:$0xff]  ;;  %s2874_s22 = scalar_lea.vmem %s1770_s5, 512  ;;  %p2879_p3 = scmp.lt.s32.totalorder %s1770_s5, %s1770_s5 }
  0x2f   :  { %2484 = vmatprep.subr.bf16.mxu1 %v2906_v0  ;;  %v86_v3 = vld [vmem:[%s3414_s7] sm:$0x1]  ;;  %v406_v16 = vshrl.u32 %v405_v13, 7  ;;  %v559_v13 = vld [vmem:[#allocation2 + $0x78] sm:$0xff]  ;;  %p2875_p2 = scmp.ne.s32.totalorder %s1770_s5, %s2874_s22  ;;  %p2880_p4 = scmp.lt.s32.totalorder %s2874_s22, %s2874_s22 }
  0x30   :  { %v90_v23 = vrot.slane %v89_v19, 4  ;;  %v102_v45 = vadd.f32 %v101_v44, %v99_v43  ;;  %v3151_v8 = vld [vmem:[%s3408_s1] sm:$0xff]  ;;  %v547_v43 = vld [vmem:[#allocation2 + $0x18] sm:$0xff]  ;;  %v3193_v44 = vld [vmem:[%s3408_s1 + $0x8] sm:$0xff] }
  0x31   :  { %v3158_v9 = vld [vmem:[%s3408_s1 + $0x40] sm:$0xff]  ;;  %v3162_v17 = vsub.s32 0, %v406_v16  ;;  %p2881_p5 = por %p2880_p4, %p2879_p3 }
  0x32   :  { %2486 = vmatpush3.bf16.msra.mxu1 %v3040_v14  ;;  %v91_v24 = vadd.f32 %v90_v23, %v89_v19  ;;  %v103_v46 = vrot.slane %v102_v45, 4  ;;  %2212 = vmatprep.mubr.msk.f32.mxu0 %vm446_vm2, %v3158_v9  ;;  %v544_v37 = vld [vmem:[#allocation2] sm:$0xff] }
  0x33   :  { %2487 = vmatprep.subr.bf16.mxu1 %v2906_v0  ;;  %v2534_v41 = vpack.c.bf16 %v545_v38, %v544_v37  ;;  %v431_v37 = vld [vmem:[#allocation2 + $0xa8] sm:$0xff]  ;;  %p2882_p6 = pnand %p2881_p5, %p2875_p2 }
  0x34   :  { %v92_v28 = vrot.slane %v91_v24, 2  ;;  %v104_v47 = vadd.f32 %v103_v46, %v102_v45  ;;  %v3198_v45 = vld [vmem:[%s3408_s1 + $0x48] sm:$0xff]  ;;  %v3203_v46 = vld [vmem:[%s3408_s1 + $0x10] sm:$0xff] }
  0x36   :  { %2489 = vmatpush3.bf16.msra.mxu1 %v3057_v20  ;;  %v93_v32 = vadd.f32 %v92_v28, %v91_v24  ;;  %v105_v48 = vrot.slane %v104_v47, 2 }
  0x37   :  { %2490 = vmatprep.subr.bf16.mxu1 %v2906_v0 }
  0x38   :  { %v94_v36 = vrot.slane %v93_v32, 1  ;;  %v106_v49 = vadd.f32 %v105_v48, %v104_v47  ;;  %v3208_v47 = vld [vmem:[%s3408_s1 + $0x50] sm:$0xff]  ;;  %v2538_v48 = vpack.c.bf16 %v547_v43, %v546_v42 }
  0x3a   :  { %2492 = vmatpush3.bf16.msra.mxu1 %v3067_v25  ;;  %v95_v40 = vadd.f32 %v94_v36, %v93_v32  ;;  %v107_v50 = vrot.slane %v106_v49, 1 }
  0x3b   :  { %2493 = vmatprep.subr.bf16.mxu1 %v2906_v0 }
  0x3c   :  { %v108_v51 = vadd.f32 %v107_v50, %v106_v49  ;;  %v548_v49 = vld [vmem:[#allocation2 + $0x20] sm:$0xff]  ;;  %v549_v50 = vld [vmem:[#allocation2 + $0x28] sm:$0xff] }
  0x3e   :  { %2495 = vmatpush3.bf16.msra.mxu1 %v3077_v29 }
  0x3f   :  { %2496 = vmatprep.subr.bf16.mxu1 %v2906_v0 }
  0x42   :  { %2498 = vmatpush3.bf16.msra.mxu1 %v3087_v33 }
  0x43   :  { %2499 = vmatprep.subr.bf16.mxu1 %v2906_v0 }
  0x46   :  { %2501 = vmatpush3.bf16.msra.mxu1 %v3101_v39 }
  0x47   :  { %2502 = vmatprep.subr.bf16.mxu1 %v2906_v0 }
  0x49   :  { %2067 = vmatmul.mubr.f32.vlgmr.msra.gmra.mrb[0].mxu1 %v95_v40 }
  0x4a   :  { %2504 = vmatpush3.bf16.msra.mxu1 %v3007_v5  ;;  %2101 = vmatprep.mubr.msk.f32.mxu1 %vm2907_vm0, %v2908_v1 }
  0x4b   :  { %2505 = vmatprep.subr.bf16.mxu1 %v2906_v0 }
  0x4e   :  { %2507 = vmatpush3.bf16.msra.mxu1 %v3013_v7 }
  0x4f   :  { %2508 = vmatprep.subr.bf16.mxu1 %v2906_v0 }
  0x52   :  { %2510 = vmatpush3.bf16.msra.mxu1 %v3040_v14 }
  0x53   :  { %2511 = vmatprep.subr.bf16.mxu1 %v2906_v0 }
  0x56   :  { %2513 = vmatpush3.bf16.msra.mxu1 %v3057_v20 }
  0x57   :  { %2514 = vmatprep.subr.bf16.mxu1 %v2906_v0 }
  0x5a   :  { %2516 = vmatpush3.bf16.msra.mxu1 %v3067_v25 }
  0x5b   :  { %2517 = vmatprep.subr.bf16.mxu1 %v2906_v0 }
  0x5e   :  { %2519 = vmatpush3.bf16.msra.mxu1 %v3077_v29 }
  0x5f   :  { %2520 = vmatprep.subr.bf16.mxu1 %v2906_v0 }
  0x62   :  { %2522 = vmatpush3.bf16.msra.mxu1 %v3087_v33 }
  0x63   :  { %2523 = vmatprep.subr.bf16.mxu1 %v2906_v0 }
  0x66   :  { %2525 = vmatpush3.bf16.msra.mxu1 %v3101_v39 }
  0x67   :  { %2104 = vmatprep.subr.mxu1 %v2908_v1 }
  0x69   :  { %2102 = vmatmul.mubr.f32.vlgmr.msra.gmra.mrb[2].mxu1 %v108_v51  ;;  %v3220_v51 = vld [vmem:[%s3408_s1 + $0x18] sm:$0xff] }
  0x6a   :  { %2106 = vmatprep.mubr.msk.f32.mxu1 %vm2907_vm0, %v2908_v1  ;;  %2105 = vmatpush3.msra.mxu1 %v3133_v52 }
  0x6b   :  { %2109 = vmatprep.subr.mxu1 %v2908_v1 }
 0x11c   :  { %v175_v53 = vpop.f32.mrb[0].mxu1 }
 0x11d   :  { %v2068_v54 = vpop.f32.mrb[1].mxu1  ;;  %v249_v55 = vmul.f32 0.001953125, %v175_v53  ;;  %v3227_v53 = vld [vmem:[%s3408_s1 + $0x58] sm:$0xff] }
 0x11e   :  { %v2542_v54 = vpack.c.bf16 %v549_v50, %v548_v49  ;;  %v433_v49 = vld [vmem:[#allocation2 + $0xb8] sm:$0xff] }
 0x11f   :  { %v251_v57 = vmul.f32 %v249_v55, %v249_v55 }
 0x13c   :  { %v245_v56 = vpop.f32.mrb[2].mxu1 }
 0x13d   :  { %v250_v58 = vmul.f32 0.001953125, %v245_v56  ;;  %v2103_v59 = vpop.f32.mrb[3].mxu1  ;;  %v551_v56 = vld [vmem:[#allocation2 + $0x38] sm:$0xff] }
 0x13e   :  { %v553_v59 = vld [vmem:[#allocation2 + $0x48] sm:$0xff] }
 0x13f   :  { %v252_v60 = vsub.f32 %v250_v58, %v251_v57  ;;  %v552_v58 = vld [vmem:[#allocation2 + $0x40] sm:$0xff] }
 0x141   :  { %v253_v61 = vadd.f32 1e-05, %v252_v60  ;;  %v2550_v60 = vpack.c.bf16 %v553_v59, %v552_v58  ;;  %v437_v58 = vld [vmem:[#allocation2 + $0xd8] sm:$0xff] }
 0x143   :  { %2822 = vrsqrt.f32 %v253_v61  ;;  %v554_v61 = vld [vmem:[#allocation2 + $0x50] sm:$0xff] }
 0x14d   :  { %v2823_v63 = vpop.eup %2822 }
 0x14e   :  { %v255_v2 = vmul.f32 %v2823_v63, %v85_v62  ;;  %v555_v62 = vld [vmem:[#allocation2 + $0x58] sm:$0xff] }
 0x14f   :  { %v2554_v63 = vpack.c.bf16 %v555_v62, %v554_v61  ;;  %v439_v61 = vld [vmem:[#allocation2 + $0xe8] sm:$0xff] }
 0x150   :  { %2107 = vmatmul.mubr.msk.f32.vlgmr.msra.gmra.mrb[4].mxu1 %vm258_vm1, %v255_v2  ;;  %v256_v4 = vmul.f32 %v255_v2, %v249_v55  ;;  %v550_v55 = vld [vmem:[#allocation2 + $0x30] sm:$0xff]  ;;  %v556_v2 = vld [vmem:[#allocation2 + $0x60] sm:$0xff] }
 0x151   :  { %2110 = vmatpush3.msra.mxu1 %v3133_v52  ;;  %2111 = vmatprep.mubr.msk.f32.mxu1 %vm2907_vm0, %v2908_v1  ;;  %v2546_v57 = vpack.c.bf16 %v551_v56, %v550_v55  ;;  %v435_v55 = vld [vmem:[#allocation2 + $0xc8] sm:$0xff] }
 0x152   :  { %v257_v6 = vsub.f32 %v86_v3, %v256_v4  ;;  %v557_v3 = vld [vmem:[#allocation2 + $0x68] sm:$0xff] }
 0x153   :  { %v2558_v4 = vpack.c.bf16 %v557_v3, %v556_v2  ;;  %v833_v2 = vld [vmem:[#allocation2 + $0x100] sm:$0xff]  ;;  %v834_v3 = vld [vmem:[#allocation2 + $0x108] sm:$0xff] }
 0x154   :  { %2112 = vmatmul.mubr.msk.f32.vlgmr.msra.gmra.mrb[6].mxu1 %vm258_vm1, %v257_v6  ;;  %v558_v6 = vld [vmem:[#allocation2 + $0x70] sm:$0xff] }
 0x155   :  { %2122 = vmatprep.mubr.msk.f32.mxu1 %vm446_vm2, %v3151_v8  ;;  %v2562_v16 = vpack.c.bf16 %v559_v13, %v558_v6  ;;  %v835_v6 = vld [vmem:[#allocation2 + $0x110] sm:$0xff]  ;;  %v836_v13 = vld [vmem:[#allocation2 + $0x118] sm:$0xff] }
 0x223   :  { %v328_v18 = vpop.f32.mrb[4].mxu1 }
 0x224   :  { %v408_v19 = vrot.slane %v328_v18, %v3162_v17  ;;  %v2108_v21 = vpop.f32.mrb[5].mxu1  ;;  %v426_v18 = vld [vmem:[#allocation2 + $0x80] sm:$0xff] }
 0x226   :  { %v409_v22 = vmul.f32 %v408_v19, %v3025_v10  ;;  %v410_v24 = vmul.f32 %v408_v19, %v3030_v11  ;;  %v411_v26 = vmul.f32 %v408_v19, %v3035_v12  ;;  %v412_v27 = vmul.f32 %v408_v19, %v3045_v15  ;;  %v427_v19 = vld [vmem:[#allocation2 + $0x88] sm:$0xff] }
 0x227   :  { %v401_v23 = vpop.f32.mrb[6].mxu1  ;;  %v2566_v21 = vpack.c.bf16 %v427_v19, %v426_v18  ;;  %v837_v18 = vld [vmem:[#allocation2 + $0x120] sm:$0xff]  ;;  %v838_v19 = vld [vmem:[#allocation2 + $0x128] sm:$0xff] }
 0x228   :  { %v416_v28 = vrot.slane %v401_v23, %v3162_v17  ;;  %v2113_v30 = vpop.f32.mrb[7].mxu1  ;;  %v429_v23 = vld [vmem:[#allocation2 + $0x98] sm:$0xff] }
 0x22a   :  { %v3170_v31 = vadd.f32 %v416_v28, %v409_v22  ;;  %v3172_v32 = vadd.f32 %v416_v28, %v410_v24  ;;  %v3174_v34 = vadd.f32 %v416_v28, %v411_v26  ;;  %v3176_v35 = vadd.f32 %v416_v28, %v412_v27  ;;  %v428_v22 = vld [vmem:[#allocation2 + $0x90] sm:$0xff] }
 0x22b   :  { %v2570_v28 = vpack.c.bf16 %v429_v23, %v428_v22  ;;  %v839_v22 = vld [vmem:[#allocation2 + $0x130] sm:$0xff]  ;;  %v840_v23 = vld [vmem:[#allocation2 + $0x138] sm:$0xff] }
 0x22c   :  { %v421_v10 = vmax.f32 %v3170_v31, 0.0  ;;  %v422_v36 = vmax.f32 %v3172_v32, 0.0  ;;  %v423_v11 = vmax.f32 %v3174_v34, 0.0  ;;  %v424_v12 = vmax.f32 %v3176_v35, 0.0  ;;  %v441_v31 = vld [vmem:[#allocation2 + $0xf8] sm:$0xff] }
 0x22d   :  { %v844_v34 = vld [vmem:[#allocation2 + $0x158] sm:$0xff] }
 0x22e   :  { %v2526_v15 = vpack.c.bf16 %v422_v36, %v421_v10  ;;  %v2530_v40 = vpack.c.bf16 %v424_v12, %v423_v11 }
 0x230   :  { %2527 = vmatprep.subr.bf16.mxu1 %v2526_v15  ;;  %2599 = vmatprep.subr.bf16.mxu0 %v2526_v15 }
 0x231   :  { %2529 = vmatpush3.bf16.msra.mxu1 %v2526_v15  ;;  %2601 = vmatpush3.bf16.msra.mxu0 %v2526_v15  ;;  %v430_v15 = vld [vmem:[#allocation2 + $0xa0] sm:$0xff] }
 0x232   :  { %2531 = vmatprep.subr.bf16.mxu1 %v2530_v40  ;;  %2603 = vmatprep.subr.bf16.mxu0 %v2530_v40  ;;  %v2574_v42 = vpack.c.bf16 %v431_v37, %v430_v15  ;;  %v845_v15 = vld [vmem:[#allocation2 + $0x160] sm:$0xff]  ;;  %v846_v37 = vld [vmem:[#allocation2 + $0x168] sm:$0xff] }
 0x233   :  { %v2630_v35 = vpack.c.bf16 %v846_v37, %v845_v15 }
 0x235   :  { %2533 = vmatpush3.bf16.msra.mxu1 %v2530_v40  ;;  %2605 = vmatpush3.bf16.msra.mxu0 %v2530_v40 }
 0x236   :  { %2535 = vmatprep.subr.bf16.mxu1 %v2534_v41  ;;  %2638 = vmatprep.subr.bf16.mxu0 %v2906_v0 }
 0x238   :  { %2123 = vmatmul.mubr.msk.f32.vlgmr.msra.gmra.mrb[8].mxu1 %vm446_vm2, %v3193_v44  ;;  %2213 = vmatmul.mubr.msk.f32.vlgmr.msra.gmra.mrb[0].mxu0 %vm446_vm2, %v3198_v45 }
 0x239   :  { %2125 = vmatprep.mubr.msk.f32.mxu1 %vm446_vm2, %v3203_v46  ;;  %2215 = vmatprep.mubr.msk.f32.mxu0 %vm446_vm2, %v3208_v47 }
 0x23a   :  { %2537 = vmatpush3.bf16.msra.mxu1 %v2534_v41  ;;  %2640 = vmatpush3.bf16.msra.mxu0 %v3007_v5 }
 0x23b   :  { %2539 = vmatprep.subr.bf16.mxu1 %v2538_v48  ;;  %2641 = vmatprep.subr.bf16.mxu0 %v2906_v0 }
 0x23c   :  { %2126 = vmatmul.mubr.msk.f32.gmra.mrb[10].mxu1 %vm446_vm2, %v3220_v51  ;;  %2216 = vmatmul.mubr.msk.f32.gmra.mrb[2].mxu0 %vm446_vm2, %v3227_v53 }
 0x23d   :  { %2288 = vmatprep.mubr.msk.f32.mxu0 %vm2907_vm0, %v2908_v1 }
 0x23e   :  { %2541 = vmatpush3.bf16.msra.mxu1 %v2538_v48  ;;  %2643 = vmatpush3.bf16.msra.mxu0 %v3013_v7  ;;  %v432_v48 = vld [vmem:[#allocation2 + $0xb0] sm:$0xff] }
 0x23f   :  { %2543 = vmatprep.subr.bf16.mxu1 %v2542_v54  ;;  %2644 = vmatprep.subr.bf16.mxu0 %v2906_v0  ;;  %v2578_v50 = vpack.c.bf16 %v433_v49, %v432_v48 }
 0x242   :  { %2545 = vmatpush3.bf16.msra.mxu1 %v2542_v54  ;;  %2646 = vmatpush3.bf16.msra.mxu0 %v3040_v14  ;;  %v434_v54 = vld [vmem:[#allocation2 + $0xc0] sm:$0xff] }
 0x243   :  { %2547 = vmatprep.subr.bf16.mxu1 %v2546_v57  ;;  %2647 = vmatprep.subr.bf16.mxu0 %v2906_v0  ;;  %v2582_v56 = vpack.c.bf16 %v435_v55, %v434_v54 }
 0x246   :  { %2549 = vmatpush3.bf16.msra.mxu1 %v2546_v57  ;;  %2649 = vmatpush3.bf16.msra.mxu0 %v3057_v20  ;;  %v436_v57 = vld [vmem:[#allocation2 + $0xd0] sm:$0xff] }
 0x247   :  { %2551 = vmatprep.subr.bf16.mxu1 %v2550_v60  ;;  %2650 = vmatprep.subr.bf16.mxu0 %v2906_v0  ;;  %v2586_v59 = vpack.c.bf16 %v437_v58, %v436_v57 }
 0x24a   :  { %2553 = vmatpush3.bf16.msra.mxu1 %v2550_v60  ;;  %2652 = vmatpush3.bf16.msra.mxu0 %v3067_v25  ;;  %v438_v60 = vld [vmem:[#allocation2 + $0xe0] sm:$0xff] }
 0x24b   :  { %2555 = vmatprep.subr.bf16.mxu1 %v2554_v63  ;;  %2653 = vmatprep.subr.bf16.mxu0 %v2906_v0  ;;  %v2590_v62 = vpack.c.bf16 %v439_v61, %v438_v60 }
 0x24e   :  { %2557 = vmatpush3.bf16.msra.mxu1 %v2554_v63  ;;  %2655 = vmatpush3.bf16.msra.mxu0 %v3077_v29  ;;  %v440_v63 = vld [vmem:[#allocation2 + $0xf0] sm:$0xff] }
 0x24f   :  { %2559 = vmatprep.subr.bf16.mxu1 %v2558_v4  ;;  %2656 = vmatprep.subr.bf16.mxu0 %v2906_v0 }
 0x252   :  { %2561 = vmatpush3.bf16.msra.mxu1 %v2558_v4  ;;  %2658 = vmatpush3.bf16.msra.mxu0 %v3087_v33  ;;  %v2606_v4 = vpack.c.bf16 %v834_v3, %v833_v2 }
 0x253   :  { %2563 = vmatprep.subr.bf16.mxu1 %v2562_v16  ;;  %2659 = vmatprep.subr.bf16.mxu0 %v2906_v0 }
 0x256   :  { %2565 = vmatpush3.bf16.msra.mxu1 %v2562_v16  ;;  %2661 = vmatpush3.bf16.msra.mxu0 %v3101_v39  ;;  %v2610_v16 = vpack.c.bf16 %v836_v13, %v835_v6 }
 0x257   :  { %2662 = vmatprep.subr.bf16.mxu0 %v2906_v0  ;;  %2567 = vmatprep.subr.bf16.mxu1 %v2566_v21 }
 0x30b   :  { %v2124_v24 = vpop.f32.mrb[8].mxu1  ;;  %v3251_v26 = vpop.f32.mrb[0].mxu0 }
 0x30c   :  { %v525_v27 = vpop.f32.mrb[9].mxu1  ;;  %v813_v30 = vpop.f32.mrb[1].mxu0 }
 0x30d   :  { %2160 = vmatprep.mubr.f32.mxu1 %v525_v27  ;;  %v841_v27 = vld [vmem:[#allocation2 + $0x140] sm:$0xff] }
 0x30e   :  { %2161 = vmatmul.mubr.f32.vlgmr.msra.gmra.mrb[12].mxu1 %v2124_v24  ;;  %v2618_v24 = vpack.c.bf16 %v840_v23, %v839_v22 }
 0x30f   :  { %2569 = vmatpush3.bf16.msra.mxu1 %v2566_v21  ;;  %v2127_v38 = vpop.f32.mrb[10].mxu1  ;;  %v3253_v40 = vpop.f32.mrb[2].mxu0  ;;  %v2614_v21 = vpack.c.bf16 %v838_v19, %v837_v18 }
 0x310   :  { %v535_v41 = vpop.f32.mrb[11].mxu1  ;;  %2571 = vmatprep.subr.bf16.mxu1 %v2570_v28  ;;  %v3255_v43 = vpop.f32.mrb[3].mxu0 }
 0x311   :  { %2163 = vmatprep.mubr.f32.mxu1 %v535_v41 }
 0x312   :  { %2164 = vmatmul.mubr.f32.gmra.mrb[14].mxu1 %v2127_v38  ;;  %v848_v38 = vld [vmem:[#allocation2 + $0x178] sm:$0xff] }
 0x313   :  { %2573 = vmatpush3.bf16.msra.mxu1 %v2570_v28  ;;  %2198 = vmatprep.mubr.f32.mxu1 %v421_v10  ;;  %v2594_v10 = vpack.c.bf16 %v441_v31, %v440_v63  ;;  %v842_v28 = vld [vmem:[#allocation2 + $0x148] sm:$0xff] }
 0x314   :  { %2575 = vmatprep.subr.bf16.mxu1 %v2574_v42  ;;  %v2622_v32 = vpack.c.bf16 %v842_v28, %v841_v27 }
 0x317   :  { %2577 = vmatpush3.bf16.msra.mxu1 %v2574_v42 }
 0x318   :  { %2579 = vmatprep.subr.bf16.mxu1 %v2578_v50 }
 0x31b   :  { %2581 = vmatpush3.bf16.msra.mxu1 %v2578_v50 }
 0x31c   :  { %2583 = vmatprep.subr.bf16.mxu1 %v2582_v56 }
 0x31f   :  { %2585 = vmatpush3.bf16.msra.mxu1 %v2582_v56 }
 0x320   :  { %2587 = vmatprep.subr.bf16.mxu1 %v2586_v59 }
 0x323   :  { %2589 = vmatpush3.bf16.msra.mxu1 %v2586_v59 }
 0x324   :  { %2591 = vmatprep.subr.bf16.mxu1 %v2590_v62 }
 0x327   :  { %2593 = vmatpush3.bf16.msra.mxu1 %v2590_v62 }
 0x328   :  { %2595 = vmatprep.subr.bf16.mxu1 %v2594_v10 }
 0x32b   :  { %2597 = vmatpush3.bf16.msra.mxu1 %v2594_v10 }
 0x32c   :  { %2607 = vmatprep.subr.bf16.mxu1 %v2606_v4 }
 0x32e   :  { %2199 = vmatmul.mubr.f32.vlgmr.msra.gmra.mrb[12].mxu1 %v422_v36  ;;  %v843_v36 = vld [vmem:[#allocation2 + $0x150] sm:$0xff] }
 0x32f   :  { %2201 = vmatprep.mubr.f32.mxu1 %v423_v11  ;;  %2609 = vmatpush3.bf16.msra.mxu1 %v2606_v4  ;;  %v2626_v11 = vpack.c.bf16 %v844_v34, %v843_v36 }
 0x330   :  { %2611 = vmatprep.subr.bf16.mxu1 %v2610_v16 }
 0x332   :  { %2202 = vmatmul.mubr.f32.gmra.mrb[14].mxu1 %v424_v12  ;;  %v847_v12 = vld [vmem:[#allocation2 + $0x170] sm:$0xff] }
 0x333   :  { %2613 = vmatpush3.bf16.msra.mxu1 %v2610_v16  ;;  %2250 = vmatprep.mubr.f32.mxu1 %v813_v30  ;;  %v2634_v30 = vpack.c.bf16 %v848_v38, %v847_v12  ;;  %v938_v16 = vld [vmem:[%s3415_s8] sm:$0x1] }
 0x334   :  { %2615 = vmatprep.subr.bf16.mxu1 %v2614_v21 }
 0x337   :  { %2617 = vmatpush3.bf16.msra.mxu1 %v2614_v21  ;;  %v939_v21 = vld [vmem:[%s3416_s9] sm:$0x1] }
 0x338   :  { %2619 = vmatprep.subr.bf16.mxu1 %v2618_v24 }
 0x33b   :  { %2621 = vmatpush3.bf16.msra.mxu1 %v2618_v24 }
 0x33c   :  { %2623 = vmatprep.subr.bf16.mxu1 %v2622_v32 }
 0x33f   :  { %2625 = vmatpush3.bf16.msra.mxu1 %v2622_v32 }
 0x340   :  { %2627 = vmatprep.subr.bf16.mxu1 %v2626_v11 }
 0x343   :  { %2629 = vmatpush3.bf16.msra.mxu1 %v2626_v11 }
 0x344   :  { %2631 = vmatprep.subr.bf16.mxu1 %v2630_v35 }
 0x347   :  { %2633 = vmatpush3.bf16.msra.mxu1 %v2630_v35 }
 0x348   :  { %2635 = vmatprep.subr.bf16.mxu1 %v2634_v30 }
 0x34b   :  { %2637 = vmatpush3.bf16.msra.mxu1 %v2634_v30 }
 0x34e   :  { %2251 = vmatmul.mubr.f32.vlgmr.msra.gmra.mrb[12].mxu1 %v3251_v26 }
 0x34f   :  { %2253 = vmatprep.mubr.f32.mxu1 %v3255_v43 }
 0x352   :  { %2254 = vmatmul.mubr.f32.gmra.mrb[14].mxu1 %v3253_v40 }
 0x353   :  { %2434 = vmatprep.mubr.msk.f32.mxu1 %vm446_vm2, %v3158_v9 }
 0x421   :  { %v3270_v41 = vpop.f32.mrb[12].mxu1 }
 0x422   :  { %v950_v42 = vmul.f32 %v3270_v41, %v3270_v41  ;;  %v3274_v48 = vpop.f32.mrb[13].mxu1 }
 0x423   :  { %v940_v49 = vadd.f32 %v3270_v41, %v3274_v48  ;;  %v949_v26 = vmul.f32 %v3274_v48, %v3274_v48 }
 0x425   :  { %v953_v50 = vadd.f32 %v950_v42, %v949_v26  ;;  %v3280_v43 = vpop.f32.mrb[14].mxu1 }
 0x426   :  { %v3282_v40 = vpop.f32.mrb[15].mxu1  ;;  %v952_v55 = vmul.f32 %v3280_v43, %v3280_v43 }
 0x427   :  { %v941_v9 = vadd.f32 %v940_v49, %v3282_v40  ;;  %v951_v54 = vmul.f32 %v3282_v40, %v3282_v40  ;;  %v1380_v49 = vld [vmem:[#allocation5 + $0x8] sm:$0xff] }
 0x429   :  { %v942_v56 = vadd.f32 %v3280_v43, %v941_v9  ;;  %v954_v57 = vadd.f32 %v953_v50, %v951_v54  ;;  %v1383_v54 = vld [vmem:[#allocation5 + $0x20] sm:$0xff] }
 0x42b   :  { %v943_v58 = vrot.slane %v942_v56, 4  ;;  %v955_v59 = vadd.f32 %v954_v57, %v952_v55  ;;  %v1384_v55 = vld [vmem:[#allocation5 + $0x28] sm:$0xff]  ;;  %v1386_v57 = vld [vmem:[#allocation5 + $0x38] sm:$0xff] }
 0x42d   :  { %v944_v60 = vadd.f32 %v943_v58, %v942_v56  ;;  %v956_v10 = vrot.slane %v955_v59, 4  ;;  %v2702_v56 = vpack.c.bf16 %v1384_v55, %v1383_v54  ;;  %v1387_v58 = vld [vmem:[#allocation5 + $0x40] sm:$0xff]  ;;  %v1657_v55 = vld [vmem:[#allocation5 + $0x130] sm:$0xff] }
 0x42f   :  { %v945_v61 = vrot.slane %v944_v60, 2  ;;  %v957_v2 = vadd.f32 %v956_v10, %v955_v59  ;;  %v1388_v59 = vld [vmem:[#allocation5 + $0x48] sm:$0xff] }
 0x431   :  { %v946_v62 = vadd.f32 %v945_v61, %v944_v60  ;;  %v1390_v60 = vld [vmem:[#allocation5 + $0x58] sm:$0xff] }
 0x433   :  { %v947_v63 = vrot.slane %v946_v62, 1 }
 0x435   :  { %v948_v31 = vadd.f32 %v947_v63, %v946_v62  ;;  %v1391_v62 = vld [vmem:[#allocation5 + $0x60] sm:$0xff]  ;;  %v1393_v63 = vld [vmem:[#allocation5 + $0x70] sm:$0xff] }
 0x437   :  { %2289 = vmatmul.mubr.f32.vlgmr.msra.gmra.mrb[4].mxu0 %v948_v31  ;;  %v1394_v31 = vld [vmem:[#allocation5 + $0x78] sm:$0xff] }
 0x438   :  { %2664 = vmatpush3.bf16.msra.mxu0 %v3007_v5  ;;  %2323 = vmatprep.mubr.msk.f32.mxu0 %vm2907_vm0, %v2908_v1  ;;  %v958_v5 = vrot.slane %v957_v2, 2  ;;  %v2722_v10 = vpack.c.bf16 %v1394_v31, %v1393_v63 }
 0x439   :  { %2665 = vmatprep.subr.bf16.mxu0 %v2906_v0 }
 0x43c   :  { %2667 = vmatpush3.bf16.msra.mxu0 %v3013_v7  ;;  %v959_v7 = vadd.f32 %v958_v5, %v957_v2  ;;  %v1278_v2 = vld [vmem:[#allocation5 + $0x80] sm:$0xff]  ;;  %v1279_v5 = vld [vmem:[#allocation5 + $0x88] sm:$0xff] }
 0x43d   :  { %2668 = vmatprep.subr.bf16.mxu0 %v2906_v0 }
 0x440   :  { %2670 = vmatpush3.bf16.msra.mxu0 %v3040_v14  ;;  %v960_v14 = vrot.slane %v959_v7, 1 }
 0x441   :  { %2671 = vmatprep.subr.bf16.mxu0 %v2906_v0 }
 0x444   :  { %2673 = vmatpush3.bf16.msra.mxu0 %v3057_v20  ;;  %v961_v20 = vadd.f32 %v960_v14, %v959_v7  ;;  %v2726_v7 = vpack.c.bf16 %v1279_v5, %v1278_v2  ;;  %v1280_v14 = vld [vmem:[#allocation5 + $0x90] sm:$0xff] }
 0x445   :  { %2674 = vmatprep.subr.bf16.mxu0 %v2906_v0 }
 0x448   :  { %2676 = vmatpush3.bf16.msra.mxu0 %v3067_v25 }
 0x449   :  { %2677 = vmatprep.subr.bf16.mxu0 %v2906_v0 }
 0x44c   :  { %2679 = vmatpush3.bf16.msra.mxu0 %v3077_v29 }
 0x44d   :  { %2680 = vmatprep.subr.bf16.mxu0 %v2906_v0 }
 0x450   :  { %2682 = vmatpush3.bf16.msra.mxu0 %v3087_v33 }
 0x451   :  { %2683 = vmatprep.subr.bf16.mxu0 %v2906_v0 }
 0x454   :  { %2685 = vmatpush3.bf16.msra.mxu0 %v3101_v39 }
 0x455   :  { %2326 = vmatprep.subr.mxu0 %v2908_v1 }
 0x457   :  { %2324 = vmatmul.mubr.f32.vlgmr.msra.gmra.mrb[6].mxu0 %v961_v20  ;;  %v1281_v20 = vld [vmem:[#allocation5 + $0x98] sm:$0xff] }
 0x458   :  { %2327 = vmatpush3.msra.mxu0 %v3133_v52  ;;  %2328 = vmatprep.mubr.msk.f32.mxu0 %vm2907_vm0, %v2908_v1 }
 0x459   :  { %2331 = vmatprep.subr.mxu0 %v2908_v1 }
 0x50a   :  { %v1028_v25 = vpop.f32.mrb[4].mxu0 }
 0x50b   :  { %v2290_v29 = vpop.f32.mrb[5].mxu0  ;;  %v1102_v3 = vmul.f32 0.001953125, %v1028_v25 }
 0x50d   :  { %v1104_v4 = vmul.f32 %v1102_v3, %v1102_v3 }
 0x52a   :  { %v1098_v33 = vpop.f32.mrb[6].mxu0 }
 0x52b   :  { %v1103_v0 = vmul.f32 0.001953125, %v1098_v33  ;;  %v2325_v6 = vpop.f32.mrb[7].mxu0  ;;  %v2730_v33 = vpack.c.bf16 %v1281_v20, %v1280_v14 }
 0x52c   :  { %v1283_v6 = vld [vmem:[#allocation5 + $0xa8] sm:$0xff] }
 0x52d   :  { %v1105_v13 = vsub.f32 %v1103_v0, %v1104_v4  ;;  %v1282_v0 = vld [vmem:[#allocation5 + $0xa0] sm:$0xff] }
 0x52f   :  { %v1106_v39 = vadd.f32 1e-05, %v1105_v13 }
 0x531   :  { %2824 = vrsqrt.f32 %v1106_v39 }
 0x53b   :  { %v2825_v18 = vpop.eup %2824 }
 0x53c   :  { %v1108_v19 = vmul.f32 %v2825_v18, %v938_v16  ;;  %v2734_v18 = vpack.c.bf16 %v1283_v6, %v1282_v0 }
 0x53e   :  { %2329 = vmatmul.mubr.msk.f32.vlgmr.msra.gmra.mrb[8].mxu0 %vm258_vm1, %v1108_v19  ;;  %v1109_v22 = vmul.f32 %v1108_v19, %v1102_v3 }
 0x53f   :  { %2332 = vmatpush3.msra.mxu0 %v3133_v52  ;;  %2333 = vmatprep.mubr.msk.f32.mxu0 %vm2907_vm0, %v2908_v1 }
 0x540   :  { %v1110_v23 = vsub.f32 %v939_v21, %v1109_v22  ;;  %v1284_v21 = vld [vmem:[#allocation5 + $0xb0] sm:$0xff]  ;;  %v1285_v22 = vld [vmem:[#allocation5 + $0xb8] sm:$0xff] }
 0x542   :  { %2334 = vmatmul.mubr.msk.f32.vlgmr.msra.gmra.mrb[10].mxu0 %vm258_vm1, %v1110_v23  ;;  %v2738_v23 = vpack.c.bf16 %v1285_v22, %v1284_v21 }
 0x543   :  { %2344 = vmatprep.mubr.msk.f32.mxu0 %vm446_vm2, %v3151_v8 }
 0x611   :  { %v1180_v24 = vpop.f32.mrb[8].mxu0 }
 0x612   :  { %v1260_v27 = vrot.slane %v1180_v24, %v3162_v17  ;;  %v2330_v28 = vpop.f32.mrb[9].mxu0  ;;  %v1286_v24 = vld [vmem:[#allocation5 + $0xc0] sm:$0xff] }
 0x614   :  { %v1261_v32 = vmul.f32 %v1260_v27, %v3274_v48  ;;  %v1262_v36 = vmul.f32 %v3270_v41, %v1260_v27  ;;  %v1263_v34 = vmul.f32 %v1260_v27, %v3282_v40  ;;  %v1264_v52 = vmul.f32 %v3280_v43, %v1260_v27  ;;  %v1379_v48 = vld [vmem:[#allocation5] sm:$0xff]  ;;  %v1381_v43 = vld [vmem:[#allocation5 + $0x10] sm:$0xff]  ;;  %v1382_v40 = vld [vmem:[#allocation5 + $0x18] sm:$0xff] }
 0x615   :  { %v1253_v11 = vpop.f32.mrb[10].mxu0  ;;  %v2694_v50 = vpack.c.bf16 %v1380_v49, %v1379_v48  ;;  %v2698_v9 = vpack.c.bf16 %v1382_v40, %v1381_v43  ;;  %v1287_v27 = vld [vmem:[#allocation5 + $0xc8] sm:$0xff]  ;;  %v1655_v40 = vld [vmem:[#allocation5 + $0x120] sm:$0xff] }
 0x616   :  { %v1268_v1 = vrot.slane %v1253_v11, %v3162_v17  ;;  %v2335_v15 = vpop.f32.mrb[11].mxu0  ;;  %v2742_v28 = vpack.c.bf16 %v1287_v27, %v1286_v24  ;;  %v1291_v11 = vld [vmem:[#allocation5 + $0xe8] sm:$0xff] }
 0x617   :  { %v1292_v15 = vld [vmem:[#allocation5 + $0xf0] sm:$0xff]  ;;  %v1652_v48 = vld [vmem:[#allocation5 + $0x108] sm:$0xff] }
 0x618   :  { %v3331_v37 = vadd.f32 %v1268_v1, %v1261_v32  ;;  %v3333_v35 = vadd.f32 %v1268_v1, %v1262_v36  ;;  %v3335_v8 = vadd.f32 %v1268_v1, %v1263_v34  ;;  %v3337_v12 = vadd.f32 %v1268_v1, %v1264_v52  ;;  %v1288_v32 = vld [vmem:[#allocation5 + $0xd0] sm:$0xff]  ;;  %v1289_v36 = vld [vmem:[#allocation5 + $0xd8] sm:$0xff]  ;;  %v1290_v52 = vld [vmem:[#allocation5 + $0xe0] sm:$0xff] }
 0x619   :  { %v2746_v34 = vpack.c.bf16 %v1289_v36, %v1288_v32  ;;  %v2750_v1 = vpack.c.bf16 %v1291_v11, %v1290_v52 }
 0x61a   :  { %v1273_v38 = vmax.f32 %v3331_v37, 0.0  ;;  %v1274_v30 = vmax.f32 %v3333_v35, 0.0  ;;  %v1275_v41 = vmax.f32 %v3335_v8, 0.0  ;;  %v1276_v42 = vmax.f32 %v3337_v12, 0.0  ;;  %v1293_v37 = vld [vmem:[#allocation5 + $0xf8] sm:$0xff] }
 0x61b   :  { %v1662_v8 = vld [vmem:[#allocation5 + $0x158] sm:$0xff] }
 0x61c   :  { %v2686_v17 = vpack.c.bf16 %v1274_v30, %v1273_v38  ;;  %v2690_v26 = vpack.c.bf16 %v1276_v42, %v1275_v41 }
 0x61e   :  { %2687 = vmatprep.subr.bf16.mxu0 %v2686_v17  ;;  %2759 = vmatprep.subr.bf16.mxu1 %v2686_v17 }
 0x61f   :  { %2689 = vmatpush3.bf16.msra.mxu0 %v2686_v17  ;;  %2761 = vmatpush3.bf16.msra.mxu1 %v2686_v17  ;;  %v1651_v17 = vld [vmem:[#allocation5 + $0x100] sm:$0xff] }
 0x620   :  { %2691 = vmatprep.subr.bf16.mxu0 %v2690_v26  ;;  %2763 = vmatprep.subr.bf16.mxu1 %v2690_v26  ;;  %v2766_v49 = vpack.c.bf16 %v1652_v48, %v1651_v17 }
 0x623   :  { %2693 = vmatpush3.bf16.msra.mxu0 %v2690_v26  ;;  %2765 = vmatpush3.bf16.msra.mxu1 %v2690_v26  ;;  %v1653_v26 = vld [vmem:[#allocation5 + $0x110] sm:$0xff] }
 0x624   :  { %2695 = vmatprep.subr.bf16.mxu0 %v2694_v50 }
 0x626   :  { %2345 = vmatmul.mubr.msk.f32.vlgmr.msra.gmra.mrb[12].mxu0 %vm446_vm2, %v3193_v44  ;;  %2435 = vmatmul.mubr.msk.f32.vlgmr.msra.gmra.mrb[16].mxu1 %vm446_vm2, %v3198_v45  ;;  %v1385_v44 = vld [vmem:[#allocation5 + $0x30] sm:$0xff] }
 0x627   :  { %2347 = vmatprep.mubr.msk.f32.mxu0 %vm446_vm2, %v3203_v46  ;;  %2437 = vmatprep.mubr.msk.f32.mxu1 %vm446_vm2, %v3208_v47  ;;  %v2706_v45 = vpack.c.bf16 %v1386_v57, %v1385_v44  ;;  %v2710_v46 = vpack.c.bf16 %v1388_v59, %v1387_v58  ;;  %v1389_v47 = vld [vmem:[#allocation5 + $0x50] sm:$0xff]  ;;  %v1659_v57 = vld [vmem:[#allocation5 + $0x140] sm:$0xff]  ;;  %v1664_v59 = vld [vmem:[#allocation5 + $0x168] sm:$0xff] }
 0x628   :  { %2697 = vmatpush3.bf16.msra.mxu0 %v2694_v50  ;;  %v2714_v61 = vpack.c.bf16 %v1390_v60, %v1389_v47  ;;  %v1654_v50 = vld [vmem:[#allocation5 + $0x118] sm:$0xff]  ;;  %v1663_v58 = vld [vmem:[#allocation5 + $0x160] sm:$0xff] }
 0x629   :  { %2699 = vmatprep.subr.bf16.mxu0 %v2698_v9  ;;  %v2770_v43 = vpack.c.bf16 %v1654_v50, %v1653_v26  ;;  %v2790_v12 = vpack.c.bf16 %v1664_v59, %v1663_v58 }
 0x62a   :  { %2348 = vmatmul.mubr.msk.f32.gmra.mrb[14].mxu0 %vm446_vm2, %v3220_v51  ;;  %2438 = vmatmul.mubr.msk.f32.gmra.mrb[18].mxu1 %vm446_vm2, %v3227_v53  ;;  %v1392_v51 = vld [vmem:[#allocation5 + $0x68] sm:$0xff] }
 0x62b   :  { %v2718_v53 = vpack.c.bf16 %v1392_v51, %v1391_v62 }
 0x62c   :  { %2701 = vmatpush3.bf16.msra.mxu0 %v2698_v9  ;;  %v1656_v9 = vld [vmem:[#allocation5 + $0x128] sm:$0xff] }
 0x62d   :  { %2703 = vmatprep.subr.bf16.mxu0 %v2702_v56  ;;  %v2774_v54 = vpack.c.bf16 %v1656_v9, %v1655_v40 }
 0x630   :  { %2705 = vmatpush3.bf16.msra.mxu0 %v2702_v56  ;;  %v1658_v56 = vld [vmem:[#allocation5 + $0x138] sm:$0xff] }
 0x631   :  { %2707 = vmatprep.subr.bf16.mxu0 %v2706_v45  ;;  %v2778_v44 = vpack.c.bf16 %v1658_v56, %v1657_v55 }
 0x634   :  { %2709 = vmatpush3.bf16.msra.mxu0 %v2706_v45  ;;  %v1660_v45 = vld [vmem:[#allocation5 + $0x148] sm:$0xff] }
 0x635   :  { %2711 = vmatprep.subr.bf16.mxu0 %v2710_v46  ;;  %v2782_v35 = vpack.c.bf16 %v1660_v45, %v1659_v57 }
 0x638   :  { %2713 = vmatpush3.bf16.msra.mxu0 %v2710_v46  ;;  %v1666_v46 = vld [vmem:[#allocation5 + $0x178] sm:$0xff] }
 0x639   :  { %2715 = vmatprep.subr.bf16.mxu0 %v2714_v61 }
 0x63c   :  { %2717 = vmatpush3.bf16.msra.mxu0 %v2714_v61  ;;  %v2826_v61 = vld [vmem:[%s3407_s0 + $0x8] sm:$0xff] }
 0x63d   :  { %2719 = vmatprep.subr.bf16.mxu0 %v2718_v53 }
 0x640   :  { %2721 = vmatpush3.bf16.msra.mxu0 %v2718_v53  ;;  %v2827_v53 = vld [vmem:[%s3407_s0] sm:$0xff] }
 0x641   :  { %2723 = vmatprep.subr.bf16.mxu0 %v2722_v10 }
 0x644   :  { %2725 = vmatpush3.bf16.msra.mxu0 %v2722_v10  ;;  %v2828_v10 = vld [vmem:[%s3407_s0 + $0x18] sm:$0xff] }
 0x645   :  { %2727 = vmatprep.subr.bf16.mxu0 %v2726_v7 }
 0x6f9   :  { %v2346_v25 = vpop.f32.mrb[12].mxu0  ;;  %v3363_v29 = vpop.f32.mrb[16].mxu1 }
 0x6fa   :  { %v1360_v3 = vpop.f32.mrb[13].mxu0  ;;  %v1631_v4 = vpop.f32.mrb[17].mxu1 }
 0x6fb   :  { %2382 = vmatprep.mubr.f32.mxu0 %v1360_v3 }
 0x6fc   :  { %2383 = vmatmul.mubr.f32.vlgmr.msra.gmra.mrb[16].mxu0 %v2346_v25 }
 0x6fd   :  { %2729 = vmatpush3.bf16.msra.mxu0 %v2726_v7  ;;  %v2349_v13 = vpop.f32.mrb[14].mxu0  ;;  %v3365_v39 = vpop.f32.mrb[18].mxu1  ;;  %v2829_v7 = vld [vmem:[%s3407_s0 + $0x10] sm:$0xff] }
 0x6fe   :  { %v1370_v16 = vpop.f32.mrb[15].mxu0  ;;  %2731 = vmatprep.subr.bf16.mxu0 %v2730_v33  ;;  %v3367_v19 = vpop.f32.mrb[19].mxu1 }
 0x6ff   :  { %2385 = vmatprep.mubr.f32.mxu0 %v1370_v16 }
 0x700   :  { %2386 = vmatmul.mubr.f32.gmra.mrb[18].mxu0 %v2349_v13 }
 0x701   :  { %2733 = vmatpush3.bf16.msra.mxu0 %v2730_v33  ;;  %2420 = vmatprep.mubr.f32.mxu0 %v1273_v38  ;;  %v2754_v38 = vpack.c.bf16 %v1293_v37, %v1292_v15 }
 0x702   :  { %2735 = vmatprep.subr.bf16.mxu0 %v2734_v18 }
 0x705   :  { %2737 = vmatpush3.bf16.msra.mxu0 %v2734_v18 }
 0x706   :  { %2739 = vmatprep.subr.bf16.mxu0 %v2738_v23 }
 0x709   :  { %2741 = vmatpush3.bf16.msra.mxu0 %v2738_v23 }
 0x70a   :  { %2743 = vmatprep.subr.bf16.mxu0 %v2742_v28 }
 0x70d   :  { %2745 = vmatpush3.bf16.msra.mxu0 %v2742_v28 }
 0x70e   :  { %2747 = vmatprep.subr.bf16.mxu0 %v2746_v34 }
 0x711   :  { %2749 = vmatpush3.bf16.msra.mxu0 %v2746_v34 }
 0x712   :  { %2751 = vmatprep.subr.bf16.mxu0 %v2750_v1 }
 0x715   :  { %2753 = vmatpush3.bf16.msra.mxu0 %v2750_v1 }
 0x716   :  { %2755 = vmatprep.subr.bf16.mxu0 %v2754_v38 }
 0x719   :  { %2757 = vmatpush3.bf16.msra.mxu0 %v2754_v38 }
 0x71a   :  { %2767 = vmatprep.subr.bf16.mxu0 %v2766_v49 }
 0x71c   :  { %2421 = vmatmul.mubr.f32.vlgmr.msra.gmra.mrb[16].mxu0 %v1274_v30  ;;  %v1661_v30 = vld [vmem:[#allocation5 + $0x150] sm:$0xff] }
 0x71d   :  { %2423 = vmatprep.mubr.f32.mxu0 %v1275_v41  ;;  %2769 = vmatpush3.bf16.msra.mxu0 %v2766_v49  ;;  %v2786_v41 = vpack.c.bf16 %v1662_v8, %v1661_v30 }
 0x71e   :  { %2771 = vmatprep.subr.bf16.mxu0 %v2770_v43 }
 0x720   :  { %2424 = vmatmul.mubr.f32.gmra.mrb[18].mxu0 %v1276_v42  ;;  %v1665_v42 = vld [vmem:[#allocation5 + $0x170] sm:$0xff] }
 0x721   :  { %2773 = vmatpush3.bf16.msra.mxu0 %v2770_v43  ;;  %2472 = vmatprep.mubr.f32.mxu0 %v1631_v4  ;;  %v2794_v47 = vpack.c.bf16 %v1666_v46, %v1665_v42 }
 0x722   :  { %2775 = vmatprep.subr.bf16.mxu0 %v2774_v54 }
 0x725   :  { %2777 = vmatpush3.bf16.msra.mxu0 %v2774_v54 }
 0x726   :  { %2779 = vmatprep.subr.bf16.mxu0 %v2778_v44 }
 0x729   :  { %2781 = vmatpush3.bf16.msra.mxu0 %v2778_v44 }
 0x72a   :  { %2783 = vmatprep.subr.bf16.mxu0 %v2782_v35 }
 0x72d   :  { %2785 = vmatpush3.bf16.msra.mxu0 %v2782_v35 }
 0x72e   :  { %2787 = vmatprep.subr.bf16.mxu0 %v2786_v41 }
 0x731   :  { %2789 = vmatpush3.bf16.msra.mxu0 %v2786_v41 }
 0x732   :  { %2791 = vmatprep.subr.bf16.mxu0 %v2790_v12 }
 0x735   :  { %2793 = vmatpush3.bf16.msra.mxu0 %v2790_v12 }
 0x736   :  { %2795 = vmatprep.subr.bf16.mxu0 %v2794_v47 }
 0x739   :  { %2797 = vmatpush3.bf16.msra.mxu0 %v2794_v47 }
 0x73c   :  { %2473 = vmatmul.mubr.f32.vlgmr.msra.gmra.mrb[16].mxu0 %v3363_v29 }
 0x73d   :  { %2475 = vmatprep.mubr.f32.mxu0 %v3367_v19 }
 0x740   :  { %2476 = vmatmul.mubr.f32.gmra.mrb[18].mxu0 %v3365_v39 }
 0x80f   :  { %v2474_v60 = vpop.f32.mrb[16].mxu0 }
 0x810   :  { %v1757_v62 = vadd.f32 %v2826_v61, %v2474_v60  ;;  %v1733_v51 = vpop.f32.mrb[17].mxu0 }
 0x811   :  { %v1756_v63 = vadd.f32 %v2827_v53, %v1733_v51 }
 0x812   :  { %1761 = vst [vmem:[#allocation7 + $0x8] sm:$0xff] %v1757_v62 }
 0x813   :  { %1760 = vst [vmem:[#allocation7] sm:$0xff] %v1756_v63  ;;  %v2477_v31 = vpop.f32.mrb[18].mxu0 }
 0x814   :  { %v1759_v2 = vadd.f32 %v2828_v10, %v2477_v31  ;;  %v1743_v5 = vpop.f32.mrb[19].mxu0 }
 0x815   :  { %v1758_v14 = vadd.f32 %v2829_v7, %v1743_v5 }
 0x816   :  { %1763 = vst [vmem:[#allocation7 + $0x18] sm:$0xff] %v1759_v2 }
 0x817   :  { %1762 = vst [vmem:[#allocation7 + $0x10] sm:$0xff] %v1758_v14 }
 0x818   :  { %2885 = shalt.err (!%p2882_p6)
}
 0x819   :  { %s2886_s27 = scalar_lea.hbm %s3417_s10, 512 }
 0x81a   :  { %p2887_p7 = scmp.ne.s32.totalorder %s3417_s10, %s2886_s27  ;;  %p2890_p8 = scmp.lt.u32.totalorder %s2886_s27, %s3417_s10 }
 0x81c   :  { %p2892_p9 = pnand %p2890_p8, %p2887_p7 }
 0x81e   :  { %2895 = shalt.err (!%p2892_p9)
}
 0x81f   :  { %1775 = dma.vmem_to_hbm [thread:$0]  %s1770_s5, 512, %s3417_s10, [#allocation4], %s2903_s23, %s2903_s23, %s2904_s24  }
 0x820   :  { %2900 = dma.done.wait [#allocation4], 512  }
 0x821   :  { %2901 = vsyncadd [#allocation4], 4294966784 }
 0x822   :  { %1779 = vsyncpa [#allocation3], 1 }
 0x823   :  { %1780 = vsyncpa [#allocation6], 1 }
 0x824   :  { %1781 = vsyncpa [#allocation4], 1 }

</bundles_post_ra>
